<compile_context>
chip_gen: v7x
topology: tpu7x:2x2x1
jax: 0.10.0
libtpu: 0.0.40
codegen_flags: <defaults>
</compile_context>

<pallas_src>
import functools

import jax
import jax.numpy as jnp
import numpy as np
from jax.experimental import pallas as pl
from jax.experimental.pallas import tpu as pltpu


def conv_layer_kernel(x_ref, params_ref, o_ref, im2col_ref, *, img_w, c_in, c_out):
    # x_ref:      (B, c_in, H*W)       VMEM  (NCHW with spatial flattened)
    # params_ref: (c_out, 128)         VMEM  packed [w1 | b1 | w2 | b2] slab
    # o_ref:      (B, c_out, H*W)      VMEM  (valid window extracted by wrapper)
    # im2col_ref: (9*c_out, H*W)       VMEM scratch
    B, _, HW = x_ref.shape

    # Unpack the single parameter slab (one DMA instead of four tiny ones).
    off_b1 = c_in
    off_w2 = c_in + 1
    off_b2 = c_in + 1 + 9 * c_out
    w1 = params_ref[:, 0:c_in]                       # (c_out, c_in)
    b1 = params_ref[:, off_b1:off_b1 + 1]            # (c_out, 1)
    w2 = params_ref[:, off_w2:off_w2 + 9 * c_out]    # (c_out, 9*c_out)
    b2 = params_ref[:, off_b2:off_b2 + 1]            # (c_out, 1)

    prec = jax.lax.Precision.HIGHEST

    for b in range(B):  # B is small & static -> unrolled
        xb = x_ref[b]                                              # (c_in, HW)

        # --- 1x1 conv + bias + ReLU (channel contraction on the MXU) ---
        h = jnp.dot(w1, xb, preferred_element_type=jnp.float32,
                    precision=prec)                                # (c_out, HW)
        h = jnp.maximum(h + b1, 0.0)

        # --- 3x3 valid conv as a single im2col matmul ---
        # tap_{ki,kj}[c, p] = h[c, p + ki*W + kj]  (left-rotate by s on lanes),
        # done with an XLU lane rotation, written directly into VMEM scratch.
        for ki in range(3):
            for kj in range(3):
                s = ki * img_w + kj
                tap = h if s == 0 else pltpu.roll(h, HW - s, axis=1)
                t = ki * 3 + kj
                im2col_ref[pl.ds(t * c_out, c_out), :] = tap

        y = jnp.dot(w2, im2col_ref[...], preferred_element_type=jnp.float32,
                    precision=prec)                                # (c_out, HW)
        o_ref[b] = jnp.maximum(y + b2, 0.0).astype(o_ref.dtype)


def conv_layer_forward(x_nchw, w1, b1, w2, b2):
    """x_nchw: (B, c_in, H, W); w1: (c_out, c_in, 1, 1); w2: (c_out, c_out, 3, 3)."""
    B, c_in, H, W = x_nchw.shape
    c_out = w1.shape[0]
    Ho, Wo = H - 2, W - 2
    HW = H * W

    # Layout glue: metadata-only reshape of the activation + tiny weight
    # re-layouts, all fused into one packed parameter slab.
    x_flat = x_nchw.reshape(B, c_in, HW)
    w1_mat = w1[:, :, 0, 0]                                       # (c_out, c_in)
    # w2_cat[o, (3*ki+kj)*c_out + c] = w2[o, c, ki, kj]  -> matches tap order.
    w2_cat = jnp.transpose(w2, (0, 2, 3, 1)).reshape(c_out, 9 * c_out)

    n_param_lanes = c_in + 1 + 9 * c_out + 1
    param_lanes = max(128, pl.cdiv(n_param_lanes, 128) * 128)
    params = jnp.zeros((c_out, param_lanes), jnp.float32)
    params = params.at[:, 0:c_in].set(w1_mat)
    params = params.at[:, c_in].set(b1)
    params = params.at[:, c_in + 1:c_in + 1 + 9 * c_out].set(w2_cat)
    params = params.at[:, c_in + 1 + 9 * c_out].set(b2)

    kernel = functools.partial(conv_layer_kernel, img_w=W, c_in=c_in, c_out=c_out)

    out_full = pl.pallas_call(
        kernel,
        out_shape=jax.ShapeDtypeStruct((B, c_out, HW), jnp.float32),
        grid_spec=pltpu.PrefetchScalarGridSpec(
            num_scalar_prefetch=0,
            grid=(1,),  # single step: whole (tiny) problem per invocation
            in_specs=[
                pl.BlockSpec((B, c_in, HW), lambda i: (0, 0, 0)),
                pl.BlockSpec((c_out, param_lanes), lambda i: (0, 0)),
            ],
            out_specs=pl.BlockSpec((B, c_out, HW), lambda i: (0, 0, 0)),
            scratch_shapes=[pltpu.VMEM((9 * c_out, HW), jnp.float32)],
        ),
        compiler_params=pltpu.CompilerParams(
            dimension_semantics=("arbitrary",)),
    )(x_flat, params)

    # Valid 3x3 window is the top-left (Ho, Wo) region of the full HxW grid.
    # Do NOT consume out_full directly: the last 2 rows/cols per image hold
    # wrap-around garbage by construction.
    return out_full.reshape(B, c_out, H, W)[:, :, :Ho, :Wo]


def reference_forward(x_nchw, w1, b1, w2, b2):
    prec = jax.lax.Precision.HIGHEST
    y = jax.lax.conv_general_dilated(
        x_nchw, w1, window_strides=(1, 1), padding="VALID",
        dimension_numbers=("NCHW", "OIHW", "NCHW"), precision=prec)
    y = jax.nn.relu(y + b1[None, :, None, None])
    y = jax.lax.conv_general_dilated(
        y, w2, window_strides=(1, 1), padding="VALID",
        dimension_numbers=("NCHW", "OIHW", "NCHW"), precision=prec)
    return jax.nn.relu(y + b2[None, :, None, None])


if __name__ == "__main__":
    B, c_in, c_out, H, W = 2, 4, 8, 16, 16

    key = jax.random.PRNGKey(0)
    k_x, k_w1, k_b1, k_w2, k_b2 = jax.random.split(key, 5)

    x = jax.random.normal(k_x, (B, c_in, H, W), dtype=jnp.float32)
    # Deterministic synthetic parameters (PyTorch Conv2d weight shapes).
    w1 = 0.3 * jax.random.normal(k_w1, (c_out, c_in, 1, 1), dtype=jnp.float32)
    b1 = 0.1 * jax.random.normal(k_b1, (c_out,), dtype=jnp.float32)
    w2 = 0.2 * jax.random.normal(k_w2, (c_out, c_out, 3, 3), dtype=jnp.float32)
    b2 = 0.1 * jax.random.normal(k_b2, (c_out,), dtype=jnp.float32)

    out = conv_layer_forward(x, w1, b1, w2, b2)
    out = jax.block_until_ready(out)

    ref = jax.block_until_ready(reference_forward(x, w1, b1, w2, b2))

    assert out.shape == (B, c_out, H - 2, W - 2), out.shape
    assert np.allclose(np.asarray(out), np.asarray(ref), atol=1e-4, rtol=1e-4)
    print("KERNEL_OK")
</pallas_src>

<mosaic_0001>
module attributes {stable_mosaic.version = 11 : i64} {
  func.func @conv_layer_kernel(%arg0: i32, %arg1: memref<2x4x256xf32, #tpu.memory_space<vmem>>, %arg2: memref<8x128xf32, #tpu.memory_space<vmem>>, %arg3: memref<2x8x256xf32, #tpu.memory_space<vmem>>, %arg4: memref<72x256xf32, #tpu.memory_space<vmem>>) attributes {dimension_semantics = [#tpu.dimension_semantics<arbitrary>], iteration_bounds = array<i64: 1>, scalar_prefetch = 0 : i64, scratch_operands = 1 : i64, tpu.core_type = #tpu.core_type<tc>, window_params = [{pipeline_mode = #tpu.pipeline_mode<synchronous>, transform_indices = @transform_0, window_bounds = array<i64: 2, 4, 256>}, {pipeline_mode = #tpu.pipeline_mode<synchronous>, transform_indices = @transform_1, window_bounds = array<i64: 8, 128>}, {pipeline_mode = #tpu.pipeline_mode<synchronous>, transform_indices = @transform_2, window_bounds = array<i64: 2, 8, 256>}]} {
    %c0 = arith.constant 0 : index
    %c0_0 = arith.constant 0 : index
    %0 = vector.load %arg2[%c0, %c0_0] : memref<8x128xf32, #tpu.memory_space<vmem>>, vector<8x4xf32>
    %c0_1 = arith.constant 0 : index
    %c4 = arith.constant 4 : index
    %1 = vector.load %arg2[%c0_1, %c4] : memref<8x128xf32, #tpu.memory_space<vmem>>, vector<8x1xf32>
    %c0_2 = arith.constant 0 : index
    %c5 = arith.constant 5 : index
    %2 = vector.load %arg2[%c0_2, %c5] : memref<8x128xf32, #tpu.memory_space<vmem>>, vector<8x72xf32>
    %c0_3 = arith.constant 0 : index
    %c77 = arith.constant 77 : index
    %3 = vector.load %arg2[%c0_3, %c77] : memref<8x128xf32, #tpu.memory_space<vmem>>, vector<8x1xf32>
    %c0_4 = arith.constant 0 : index
    %c0_5 = arith.constant 0 : index
    %c0_6 = arith.constant 0 : index
    %4 = vector.load %arg1[%c0_4, %c0_5, %c0_6] : memref<2x4x256xf32, #tpu.memory_space<vmem>>, vector<1x4x256xf32>
    %5 = vector.shape_cast %4 : vector<1x4x256xf32> to vector<4x256xf32>
    %cst = arith.constant dense<0.000000e+00> : vector<8x256xf32>
    %6 = tpu.matmul %0, %5, %cst {dimension_numbers = #tpu.dot_dimension_numbers<[1], [0], [0], [1], [0, 0, 1, 1], [], []>, precision = #tpu.contract_precision<fp32>} : vector<8x4xf32>, vector<4x256xf32>, vector<8x256xf32> -> vector<8x256xf32>
    %7 = vector.broadcast %1 : vector<8x1xf32> to vector<8x256xf32>
    %8 = arith.addf %6, %7 : vector<8x256xf32>
    %cst_7 = arith.constant 0.000000e+00 : f32
    %9 = vector.broadcast %cst_7 : f32 to vector<8x256xf32>
    %10 = arith.maximumf %8, %9 : vector<8x256xf32>
    %c0_8 = arith.constant 0 : index
    %c0_9 = arith.constant 0 : index
    %11 = vector.load %arg4[%c0_8, %c0_9] : memref<72x256xf32, #tpu.memory_space<vmem>>, vector<8x256xf32>
    tpu.vector_store %arg4[%c0_8, %c0_9], %10 {strides = array<i32>} : memref<72x256xf32, #tpu.memory_space<vmem>>, vector<8x256xf32>,
    %c255_i32 = arith.constant 255 : i32
    %12 = tpu.dynamic_rotate %10 by %c255_i32 dim 1 : vector<8x256xf32>, i32 -> vector<8x256xf32>
    %c8 = arith.constant 8 : index
    %c0_10 = arith.constant 0 : index
    %13 = vector.load %arg4[%c8, %c0_10] : memref<72x256xf32, #tpu.memory_space<vmem>>, vector<8x256xf32>
    tpu.vector_store %arg4[%c8, %c0_10], %12 {strides = array<i32>} : memref<72x256xf32, #tpu.memory_space<vmem>>, vector<8x256xf32>,
    %c254_i32 = arith.constant 254 : i32
    %14 = tpu.dynamic_rotate %10 by %c254_i32 dim 1 : vector<8x256xf32>, i32 -> vector<8x256xf32>
    %c16 = arith.constant 16 : index
    %c0_11 = arith.constant 0 : index
    %15 = vector.load %arg4[%c16, %c0_11] : memref<72x256xf32, #tpu.memory_space<vmem>>, vector<8x256xf32>
    tpu.vector_store %arg4[%c16, %c0_11], %14 {strides = array<i32>} : memref<72x256xf32, #tpu.memory_space<vmem>>, vector<8x256xf32>,
    %c240_i32 = arith.constant 240 : i32
    %16 = tpu.dynamic_rotate %10 by %c240_i32 dim 1 : vector<8x256xf32>, i32 -> vector<8x256xf32>
    %c24 = arith.constant 24 : index
    %c0_12 = arith.constant 0 : index
    %17 = vector.load %arg4[%c24, %c0_12] : memref<72x256xf32, #tpu.memory_space<vmem>>, vector<8x256xf32>
    tpu.vector_store %arg4[%c24, %c0_12], %16 {strides = array<i32>} : memref<72x256xf32, #tpu.memory_space<vmem>>, vector<8x256xf32>,
    %c239_i32 = arith.constant 239 : i32
    %18 = tpu.dynamic_rotate %10 by %c239_i32 dim 1 : vector<8x256xf32>, i32 -> vector<8x256xf32>
    %c32 = arith.constant 32 : index
    %c0_13 = arith.constant 0 : index
    %19 = vector.load %arg4[%c32, %c0_13] : memref<72x256xf32, #tpu.memory_space<vmem>>, vector<8x256xf32>
    tpu.vector_store %arg4[%c32, %c0_13], %18 {strides = array<i32>} : memref<72x256xf32, #tpu.memory_space<vmem>>, vector<8x256xf32>,
    %c238_i32 = arith.constant 238 : i32
    %20 = tpu.dynamic_rotate %10 by %c238_i32 dim 1 : vector<8x256xf32>, i32 -> vector<8x256xf32>
    %c40 = arith.constant 40 : index
    %c0_14 = arith.constant 0 : index
    %21 = vector.load %arg4[%c40, %c0_14] : memref<72x256xf32, #tpu.memory_space<vmem>>, vector<8x256xf32>
    tpu.vector_store %arg4[%c40, %c0_14], %20 {strides = array<i32>} : memref<72x256xf32, #tpu.memory_space<vmem>>, vector<8x256xf32>,
    %c224_i32 = arith.constant 224 : i32
    %22 = tpu.dynamic_rotate %10 by %c224_i32 dim 1 : vector<8x256xf32>, i32 -> vector<8x256xf32>
    %c48 = arith.constant 48 : index
    %c0_15 = arith.constant 0 : index
    %23 = vector.load %arg4[%c48, %c0_15] : memref<72x256xf32, #tpu.memory_space<vmem>>, vector<8x256xf32>
    tpu.vector_store %arg4[%c48, %c0_15], %22 {strides = array<i32>} : memref<72x256xf32, #tpu.memory_space<vmem>>, vector<8x256xf32>,
    %c223_i32 = arith.constant 223 : i32
    %24 = tpu.dynamic_rotate %10 by %c223_i32 dim 1 : vector<8x256xf32>, i32 -> vector<8x256xf32>
    %c56 = arith.constant 56 : index
    %c0_16 = arith.constant 0 : index
    %25 = vector.load %arg4[%c56, %c0_16] : memref<72x256xf32, #tpu.memory_space<vmem>>, vector<8x256xf32>
    tpu.vector_store %arg4[%c56, %c0_16], %24 {strides = array<i32>} : memref<72x256xf32, #tpu.memory_space<vmem>>, vector<8x256xf32>,
    %c222_i32 = arith.constant 222 : i32
    %26 = tpu.dynamic_rotate %10 by %c222_i32 dim 1 : vector<8x256xf32>, i32 -> vector<8x256xf32>
    %c64 = arith.constant 64 : index
    %c0_17 = arith.constant 0 : index
    %27 = vector.load %arg4[%c64, %c0_17] : memref<72x256xf32, #tpu.memory_space<vmem>>, vector<8x256xf32>
    tpu.vector_store %arg4[%c64, %c0_17], %26 {strides = array<i32>} : memref<72x256xf32, #tpu.memory_space<vmem>>, vector<8x256xf32>,
    %c0_18 = arith.constant 0 : index
    %c0_19 = arith.constant 0 : index
    %28 = vector.load %arg4[%c0_18, %c0_19] : memref<72x256xf32, #tpu.memory_space<vmem>>, vector<72x256xf32>
    %cst_20 = arith.constant dense<0.000000e+00> : vector<8x256xf32>
    %29 = tpu.matmul %2, %28, %cst_20 {dimension_numbers = #tpu.dot_dimension_numbers<[1], [0], [0], [1], [0, 0, 1, 1], [], []>, precision = #tpu.contract_precision<fp32>} : vector<8x72xf32>, vector<72x256xf32>, vector<8x256xf32> -> vector<8x256xf32>
    %30 = vector.broadcast %3 : vector<8x1xf32> to vector<8x256xf32>
    %31 = arith.addf %29, %30 : vector<8x256xf32>
    %cst_21 = arith.constant 0.000000e+00 : f32
    %32 = vector.broadcast %cst_21 : f32 to vector<8x256xf32>
    %33 = arith.maximumf %31, %32 : vector<8x256xf32>
    %c0_22 = arith.constant 0 : index
    %c0_23 = arith.constant 0 : index
    %c0_24 = arith.constant 0 : index
    %34 = vector.load %arg3[%c0_22, %c0_23, %c0_24] : memref<2x8x256xf32, #tpu.memory_space<vmem>>, vector<1x8x256xf32>
    %35 = vector.shape_cast %34 : vector<1x8x256xf32> to vector<8x256xf32>
    %36 = vector.shape_cast %33 : vector<8x256xf32> to vector<1x8x256xf32>
    tpu.vector_store %arg3[%c0_22, %c0_23, %c0_24], %36 {strides = array<i32>} : memref<2x8x256xf32, #tpu.memory_space<vmem>>, vector<1x8x256xf32>,
    %c1 = arith.constant 1 : index
    %c0_25 = arith.constant 0 : index
    %c0_26 = arith.constant 0 : index
    %37 = vector.load %arg1[%c1, %c0_25, %c0_26] : memref<2x4x256xf32, #tpu.memory_space<vmem>>, vector<1x4x256xf32>
    %38 = vector.shape_cast %37 : vector<1x4x256xf32> to vector<4x256xf32>
    %cst_27 = arith.constant dense<0.000000e+00> : vector<8x256xf32>
    %39 = tpu.matmul %0, %38, %cst_27 {dimension_numbers = #tpu.dot_dimension_numbers<[1], [0], [0], [1], [0, 0, 1, 1], [], []>, precision = #tpu.contract_precision<fp32>} : vector<8x4xf32>, vector<4x256xf32>, vector<8x256xf32> -> vector<8x256xf32>
    %40 = vector.broadcast %1 : vector<8x1xf32> to vector<8x256xf32>
    %41 = arith.addf %39, %40 : vector<8x256xf32>
    %cst_28 = arith.constant 0.000000e+00 : f32
    %42 = vector.broadcast %cst_28 : f32 to vector<8x256xf32>
    %43 = arith.maximumf %41, %42 : vector<8x256xf32>
    %c0_29 = arith.constant 0 : index
    %c0_30 = arith.constant 0 : index
    %44 = vector.load %arg4[%c0_29, %c0_30] : memref<72x256xf32, #tpu.memory_space<vmem>>, vector<8x256xf32>
    tpu.vector_store %arg4[%c0_29, %c0_30], %43 {strides = array<i32>} : memref<72x256xf32, #tpu.memory_space<vmem>>, vector<8x256xf32>,
    %c255_i32_31 = arith.constant 255 : i32
    %45 = tpu.dynamic_rotate %43 by %c255_i32_31 dim 1 : vector<8x256xf32>, i32 -> vector<8x256xf32>
    %c8_32 = arith.constant 8 : index
    %c0_33 = arith.constant 0 : index
    %46 = vector.load %arg4[%c8_32, %c0_33] : memref<72x256xf32, #tpu.memory_space<vmem>>, vector<8x256xf32>
    tpu.vector_store %arg4[%c8_32, %c0_33], %45 {strides = array<i32>} : memref<72x256xf32, #tpu.memory_space<vmem>>, vector<8x256xf32>,
    %c254_i32_34 = arith.constant 254 : i32
    %47 = tpu.dynamic_rotate %43 by %c254_i32_34 dim 1 : vector<8x256xf32>, i32 -> vector<8x256xf32>
    %c16_35 = arith.constant 16 : index
    %c0_36 = arith.constant 0 : index
    %48 = vector.load %arg4[%c16_35, %c0_36] : memref<72x256xf32, #tpu.memory_space<vmem>>, vector<8x256xf32>
    tpu.vector_store %arg4[%c16_35, %c0_36], %47 {strides = array<i32>} : memref<72x256xf32, #tpu.memory_space<vmem>>, vector<8x256xf32>,
    %c240_i32_37 = arith.constant 240 : i32
    %49 = tpu.dynamic_rotate %43 by %c240_i32_37 dim 1 : vector<8x256xf32>, i32 -> vector<8x256xf32>
    %c24_38 = arith.constant 24 : index
    %c0_39 = arith.constant 0 : index
    %50 = vector.load %arg4[%c24_38, %c0_39] : memref<72x256xf32, #tpu.memory_space<vmem>>, vector<8x256xf32>
    tpu.vector_store %arg4[%c24_38, %c0_39], %49 {strides = array<i32>} : memref<72x256xf32, #tpu.memory_space<vmem>>, vector<8x256xf32>,
    %c239_i32_40 = arith.constant 239 : i32
    %51 = tpu.dynamic_rotate %43 by %c239_i32_40 dim 1 : vector<8x256xf32>, i32 -> vector<8x256xf32>
    %c32_41 = arith.constant 32 : index
    %c0_42 = arith.constant 0 : index
    %52 = vector.load %arg4[%c32_41, %c0_42] : memref<72x256xf32, #tpu.memory_space<vmem>>, vector<8x256xf32>
    tpu.vector_store %arg4[%c32_41, %c0_42], %51 {strides = array<i32>} : memref<72x256xf32, #tpu.memory_space<vmem>>, vector<8x256xf32>,
    %c238_i32_43 = arith.constant 238 : i32
    %53 = tpu.dynamic_rotate %43 by %c238_i32_43 dim 1 : vector<8x256xf32>, i32 -> vector<8x256xf32>
    %c40_44 = arith.constant 40 : index
    %c0_45 = arith.constant 0 : index
    %54 = vector.load %arg4[%c40_44, %c0_45] : memref<72x256xf32, #tpu.memory_space<vmem>>, vector<8x256xf32>
    tpu.vector_store %arg4[%c40_44, %c0_45], %53 {strides = array<i32>} : memref<72x256xf32, #tpu.memory_space<vmem>>, vector<8x256xf32>,
    %c224_i32_46 = arith.constant 224 : i32
    %55 = tpu.dynamic_rotate %43 by %c224_i32_46 dim 1 : vector<8x256xf32>, i32 -> vector<8x256xf32>
    %c48_47 = arith.constant 48 : index
    %c0_48 = arith.constant 0 : index
    %56 = vector.load %arg4[%c48_47, %c0_48] : memref<72x256xf32, #tpu.memory_space<vmem>>, vector<8x256xf32>
    tpu.vector_store %arg4[%c48_47, %c0_48], %55 {strides = array<i32>} : memref<72x256xf32, #tpu.memory_space<vmem>>, vector<8x256xf32>,
    %c223_i32_49 = arith.constant 223 : i32
    %57 = tpu.dynamic_rotate %43 by %c223_i32_49 dim 1 : vector<8x256xf32>, i32 -> vector<8x256xf32>
    %c56_50 = arith.constant 56 : index
    %c0_51 = arith.constant 0 : index
    %58 = vector.load %arg4[%c56_50, %c0_51] : memref<72x256xf32, #tpu.memory_space<vmem>>, vector<8x256xf32>
    tpu.vector_store %arg4[%c56_50, %c0_51], %57 {strides = array<i32>} : memref<72x256xf32, #tpu.memory_space<vmem>>, vector<8x256xf32>,
    %c222_i32_52 = arith.constant 222 : i32
    %59 = tpu.dynamic_rotate %43 by %c222_i32_52 dim 1 : vector<8x256xf32>, i32 -> vector<8x256xf32>
    %c64_53 = arith.constant 64 : index
    %c0_54 = arith.constant 0 : index
    %60 = vector.load %arg4[%c64_53, %c0_54] : memref<72x256xf32, #tpu.memory_space<vmem>>, vector<8x256xf32>
    tpu.vector_store %arg4[%c64_53, %c0_54], %59 {strides = array<i32>} : memref<72x256xf32, #tpu.memory_space<vmem>>, vector<8x256xf32>,
    %c0_55 = arith.constant 0 : index
    %c0_56 = arith.constant 0 : index
    %61 = vector.load %arg4[%c0_55, %c0_56] : memref<72x256xf32, #tpu.memory_space<vmem>>, vector<72x256xf32>
    %cst_57 = arith.constant dense<0.000000e+00> : vector<8x256xf32>
    %62 = tpu.matmul %2, %61, %cst_57 {dimension_numbers = #tpu.dot_dimension_numbers<[1], [0], [0], [1], [0, 0, 1, 1], [], []>, precision = #tpu.contract_precision<fp32>} : vector<8x72xf32>, vector<72x256xf32>, vector<8x256xf32> -> vector<8x256xf32>
    %63 = vector.broadcast %3 : vector<8x1xf32> to vector<8x256xf32>
    %64 = arith.addf %62, %63 : vector<8x256xf32>
    %cst_58 = arith.constant 0.000000e+00 : f32
    %65 = vector.broadcast %cst_58 : f32 to vector<8x256xf32>
    %66 = arith.maximumf %64, %65 : vector<8x256xf32>
    %c1_59 = arith.constant 1 : index
    %c0_60 = arith.constant 0 : index
    %c0_61 = arith.constant 0 : index
    %67 = vector.load %arg3[%c1_59, %c0_60, %c0_61] : memref<2x8x256xf32, #tpu.memory_space<vmem>>, vector<1x8x256xf32>
    %68 = vector.shape_cast %67 : vector<1x8x256xf32> to vector<8x256xf32>
    %69 = vector.shape_cast %66 : vector<8x256xf32> to vector<1x8x256xf32>
    tpu.vector_store %arg3[%c1_59, %c0_60, %c0_61], %69 {strides = array<i32>} : memref<2x8x256xf32, #tpu.memory_space<vmem>>, vector<1x8x256xf32>,
    return
  }
  func.func @transform_0(%arg0: i32) -> (i32, i32, i32) {
    %c0_i32 = arith.constant 0 : i32
    %c0_i32_0 = arith.constant 0 : i32
    %c0_i32_1 = arith.constant 0 : i32
    %c0_i32_2 = arith.constant 0 : i32
    return %c0_i32, %c0_i32_0, %c0_i32_1 : i32, i32, i32
  }
  func.func @transform_1(%arg0: i32) -> (i32, i32) {
    %c0_i32 = arith.constant 0 : i32
    %c0_i32_0 = arith.constant 0 : i32
    %c0_i32_1 = arith.constant 0 : i32
    return %c0_i32, %c0_i32_0 : i32, i32
  }
  func.func @transform_2(%arg0: i32) -> (i32, i32, i32) {
    %c0_i32 = arith.constant 0 : i32
    %c0_i32_0 = arith.constant 0 : i32
    %c0_i32_1 = arith.constant 0 : i32
    %c0_i32_2 = arith.constant 0 : i32
    return %c0_i32, %c0_i32_0, %c0_i32_1 : i32, i32, i32
  }
}

</mosaic_0001>

<bundles_post_ra>
// kernel: tpu_custom_call.1
= control target key start
LH: loop header
LB: loop body
LE: loop exit
PB: predicated region body
PF: predicated region fallthrough
CT: control target
= control target key end

     0   :  { %7 = vsyncpa [#allocation4], 0  ;;  %s3711_s0 = inlined_call_operand.hbm [shape: f32[2,4,256], index: 0, kind: input, shape index: {}]   ;;  %s3712_s1 = inlined_call_operand.hbm [shape: f32[8,128], index: 1, kind: input, shape index: {}]   ;;  %s3713_s2 = inlined_call_operand.hbm [shape: f32[2,8,256], index: 2, kind: output, shape index: {}]  }
   0x1   :  { %8 = vsyncpa [#allocation7], 0 }
   0x2   :  { %9 = vsyncpa [#allocation5], 0  ;;  %s2892_s9 = smov [#allocation3]   ;;  %s2820_s13 = scalar_lea.hbm %s3711_s0, 256 }
   0x3   :  { %s15_s10 = sshll.u32 %s2892_s9, 4  ;;  %p2821_p0 = scmp.ne.s32.totalorder %s3711_s0, %s2820_s13  ;;  %s16_s10 = int_to_ptr.vmem [resolvable:$true] %s15_s10 }
   0x4   :  { %p2824_p1 = scmp.lt.u32.totalorder %s2820_s13, %s3711_s0 }
   0x6   :  { %p2826_p2 = pnand %p2824_p1, %p2821_p0 }
   0x8   :  { %2829 = shalt.err (!%p2826_p2)
}
   0x9   :  { %s2830_s18 = scalar_lea.vmem %s16_s10, 256  ;;  %p2835_p4 = scmp.lt.s32.totalorder %s16_s10, %s16_s10 }
   0xa   :  { %p2831_p3 = scmp.ne.s32.totalorder %s16_s10, %s2830_s18  ;;  %p2836_p5 = scmp.lt.s32.totalorder %s2830_s18, %s2830_s18 }
   0xc   :  { %p2837_p6 = por %p2836_p5, %p2835_p4 }
   0xe   :  { %p2838_p7 = pnand %p2837_p6, %p2831_p3 }
  0x10   :  { %2841 = shalt.err (!%p2838_p7)
}
  0x11   :  { %s2893_s19 = smov 128   ;;  %s2894_s20 = smov 8  }
  0x12   :  { %21 = dma.hbm_to_vmem [thread:$0]  %s3711_s0, 256, %s16_s10, [#allocation4], %s2893_s19, %s2893_s19, %s2894_s20  }
  0x13   :  { %s2895_s23 = smov [#allocation6]   ;;  %s2842_s27 = scalar_lea.hbm %s3712_s1, 128 }
  0x14   :  { %s28_s24 = sshll.u32 %s2895_s23, 4  ;;  %p2843_p8 = scmp.ne.s32.totalorder %s3712_s1, %s2842_s27  ;;  %s29_s24 = int_to_ptr.vmem [resolvable:$true] %s28_s24 }
  0x15   :  { %p2846_p9 = scmp.lt.u32.totalorder %s2842_s27, %s3712_s1 }
  0x17   :  { %p2848_p10 = pnand %p2846_p9, %p2843_p8 }
  0x19   :  { %2851 = shalt.err (!%p2848_p10)
}
  0x1a   :  { %s2852_s4 = scalar_lea.vmem %s29_s24, 128  ;;  %p2857_p12 = scmp.lt.s32.totalorder %s29_s24, %s29_s24 }
  0x1b   :  { %p2853_p11 = scmp.ne.s32.totalorder %s29_s24, %s2852_s4  ;;  %p2858_p13 = scmp.lt.s32.totalorder %s2852_s4, %s2852_s4 }
  0x1d   :  { %p2859_p0 = por %p2858_p13, %p2857_p12 }
  0x1f   :  { %p2860_p1 = pnand %p2859_p0, %p2853_p11 }
  0x21   :  { %2863 = shalt.err (!%p2860_p1)
}
  0x22   :  { %31 = dma.hbm_to_vmem [thread:$0]  %s3712_s1, 128, %s29_s24, [#allocation7]  }
  0x23   :  { %2886 = dma.done.wait [#allocation4], 256  }
  0x24   :  { %2887 = vsyncadd [#allocation4], 4294967040 }
  0x25   :  { %2888 = dma.done.wait [#allocation7], 128  }
  0x26   :  { %2889 = vsyncadd [#allocation7], 4294967168  ;;  %v3727_v0 = vmov 0.0   ;;  %v2897_v1 = vmov 4   ;;  %vm50_vm0 = vcmask 1043456   ;;  %vm47_vm1 = vcmask 31744  }
  0x27   :  { %207 = vmatprep.mubr.f32.mxu0 %v3727_v0  ;;  %121 = vmatprep.mubr.f32.mxu1 %v3727_v0  ;;  %v39_v2 = vld [vmem:[#allocation3] sm:$0xff]  ;;  %v2952_v3 = vld [vmem:[#allocation6] sm:$0xff]  ;;  %v1303_v23 = vld [vmem:[#allocation3 + $0x8] sm:$0xff]  ;;  %s2898_s1 = smov 126   ;;  %s2899_s6 = smov 127   ;;  %v528_v56 = vlaneseq  ;;  %vm622_vm9 = vcmask 588800  }
  0x28   :  { %2816 = vset.pattern.permute.xlu0 %v2897_v1  ;;  %v46_v4 = vcombine.high %v39_v2, %v39_v2  ;;  %v51_v5 = vsel %vm50_vm0, %v39_v2, 0  ;;  %v48_v6 = vsel %vm47_vm1, %v2952_v3, 0  ;;  %v1305_v24 = vcombine.high %v1303_v23, %v1303_v23  ;;  %s2900_s7 = smov 112   ;;  %s2901_s8 = smov 111  }
  0x29   :  { %42 = vperm.xlu0 %2816, %v2952_v3   ;;  %v57_v7 = vand.u32 4294901760, %v51_v5  ;;  %v2957_v8 = vand.u32 4294901760, %v48_v6  ;;  %v1306_v27 = vsel %vm50_vm0, %v1303_v23, 0  ;;  %s2902_s9 = smov 110   ;;  %s2903_s10 = smov 96   ;;  %v3042_v58 = vand.u32 127, %v528_v56 }
  0x2a   :  { %v53_v9 = vsel %vm50_vm0, %v46_v4, 0  ;;  %v1308_v25 = vsel %vm50_vm0, %v1305_v24, 0  ;;  %v1312_v28 = vand.u32 4294901760, %v1306_v27  ;;  %s2904_s11 = smov 95   ;;  %s2905_s12 = smov 123  }
  0x2b   :  { %v55_v10 = vand.u32 4294901760, %v53_v9  ;;  %v140_v11 = vsub.f32 %v51_v5, %v57_v7  ;;  %v123_v12 = vsub.f32 %v48_v6, %v2957_v8  ;;  %v1310_v26 = vand.u32 4294901760, %v1308_v25  ;;  %s2906_s13 = smov 94   ;;  %s2908_s14 = smov [#allocation8]  }
  0x2c   :  { %v1395_v30 = vsub.f32 %v1306_v27, %v1312_v28  ;;  %vm539_vm2 = vcmp.lt.s32.totalorder %v3042_v58, 126  ;;  %vm530_vm3 = vcmp.lt.s32.totalorder %v3042_v58, 127  ;;  %vm548_vm4 = vcmp.lt.s32.totalorder %v3042_v58, 112  ;;  %s2544_s15 = sshll.u32 %s2908_s14, 4  ;;  %s2545_s15 = int_to_ptr.vmem [resolvable:$true] %s2544_s15 }
  0x2d   :  { %v134_v13 = vsub.f32 %v53_v9, %v55_v10  ;;  %v141_v14 = vand.u32 4294901760, %v140_v11  ;;  %v124_v15 = vand.u32 4294901760, %v123_v12  ;;  %56 = vmatprep.subr.mxu1 %v55_v10  ;;  %v1389_v29 = vsub.f32 %v1308_v25, %v1310_v26  ;;  %s2864_s16 = scalar_lea.vmem %s2545_s15, 512  ;;  %p2869_p3 = scmp.lt.s32.totalorder %s2545_s15, %s2545_s15 }
  0x2e   :  { %58 = vmatpush1.msra.mxu1 %v57_v7  ;;  %v1396_v32 = vand.u32 4294901760, %v1395_v30  ;;  %vm566_vm5 = vcmp.lt.s32.totalorder %v3042_v58, 110  ;;  %vm557_vm6 = vcmp.lt.s32.totalorder %v3042_v58, 111  ;;  %vm575_vm7 = vcmp.lt.s32.totalorder %v3042_v58, 96  ;;  %p2865_p2 = scmp.ne.s32.totalorder %s2545_s15, %s2864_s16  ;;  %p2870_p4 = scmp.lt.s32.totalorder %s2864_s16, %s2864_s16 }
  0x2f   :  { %v135_v16 = vand.u32 4294901760, %v134_v13  ;;  %v142_v17 = vsub.f32 %v140_v11, %v141_v14  ;;  %v125_v18 = vsub.f32 %v123_v12, %v124_v15  ;;  %v1390_v31 = vand.u32 4294901760, %v1389_v29 }
  0x30   :  { %v1397_v34 = vsub.f32 %v1395_v30, %v1396_v32  ;;  %vm584_vm8 = vcmp.lt.s32.totalorder %v3042_v58, 95  ;;  %vm593_vm10 = vcmp.lt.s32.totalorder %v3042_v58, 94  ;;  %p2871_p5 = por %p2870_p4, %p2869_p3 }
  0x31   :  { %v136_v19 = vsub.f32 %v134_v13, %v135_v16  ;;  %v126_v20 = vand.u32 4294901760, %v125_v18  ;;  %v143_v21 = vand.u32 4294901760, %v142_v17  ;;  %v1391_v33 = vsub.f32 %v1389_v29, %v1390_v31 }
  0x32   :  { %v1398_v36 = vand.u32 4294901760, %v1397_v34  ;;  %p2872_p6 = pnand %p2871_p5, %p2865_p2 }
  0x33   :  { %v137_v22 = vand.u32 4294901760, %v136_v19  ;;  %127 = vmatmul.mubr.f32.vlgmr.msra.gmra.mrb[0].mxu1 %v126_v20  ;;  %v1392_v35 = vand.u32 4294901760, %v1391_v33 }
  0x34   :  { %707 = vmatprep.mubr.f32.mxu1 %v3727_v0 }
  0x35   :  { %138 = vmatprep.subr.mxu0 %v137_v22 }
  0x36   :  { %144 = vmatpush1.msra.mxu0 %v143_v21 }
  0x37   :  { %209 = vmatmul.mubr.f32.vlgmr.msra.gmra.mrb[0].mxu0 %v2957_v8  ;;  %217 = vmatprep.subr.mxu0 %v134_v13 }
  0x38   :  { %220 = vmatpush1.msra.mxu0 %v140_v11  ;;  %283 = vmatprep.mubr.f32.mxu0 %v3727_v0 }
  0x39   :  { %293 = vmatprep.subr.mxu0 %v55_v10 }
  0x3f   :  { %286 = vmatmul.mubr.f32.vlgmr.msra.gmra.mrb[0].mxu0 %v123_v12 }
  0x40   :  { %295 = vmatpush1.msra.mxu0 %v57_v7  ;;  %358 = vmatprep.mubr.f32.mxu0 %v3727_v0 }
  0x41   :  { %371 = vmatprep.subr.mxu0 %v135_v16 }
  0x47   :  { %362 = vmatmul.mubr.f32.vlgmr.msra.gmra.mrb[0].mxu0 %v124_v15 }
  0x48   :  { %375 = vmatpush1.msra.mxu0 %v141_v14  ;;  %438 = vmatprep.mubr.f32.mxu0 %v3727_v0 }
  0x49   :  { %447 = vmatprep.subr.mxu0 %v55_v10 }
  0x4f   :  { %440 = vmatmul.mubr.f32.vlgmr.msra.gmra.mrb[0].mxu0 %v2957_v8 }
  0x50   :  { %449 = vmatpush1.msra.mxu0 %v57_v7  ;;  %512 = vmatprep.mubr.f32.mxu0 %v3727_v0 }
  0x51   :  { %1311 = vmatprep.subr.mxu0 %v1310_v26 }
  0x57   :  { %514 = vmatmul.mubr.f32.vlgmr.msra.gmra.mrb[0].mxu0 %v2957_v8 }
  0x58   :  { %1313 = vmatpush1.msra.mxu0 %v1312_v28  ;;  %1376 = vmatprep.mubr.f32.mxu0 %v3727_v0 }
  0x59   :  { %1393 = vmatprep.subr.mxu0 %v1392_v35 }
  0x5b   :  { %1382 = vmatmul.mubr.f32.vlgmr.msra.gmra.mrb[2].mxu0 %v126_v20 }
  0x5c   :  { %1399 = vmatpush1.msra.mxu0 %v1398_v36  ;;  %1462 = vmatprep.mubr.f32.mxu0 %v3727_v0 }
  0x5d   :  { %1472 = vmatprep.subr.mxu0 %v1389_v29 }
  0x63   :  { %1464 = vmatmul.mubr.f32.vlgmr.msra.gmra.mrb[2].mxu0 %v2957_v8 }
  0x64   :  { %1475 = vmatpush1.msra.mxu0 %v1395_v30  ;;  %1538 = vmatprep.mubr.f32.mxu0 %v3727_v0 }
  0x65   :  { %1548 = vmatprep.subr.mxu0 %v1310_v26 }
  0x6b   :  { %1541 = vmatmul.mubr.f32.vlgmr.msra.gmra.mrb[2].mxu0 %v123_v12 }
  0x6c   :  { %1550 = vmatpush1.msra.mxu0 %v1312_v28  ;;  %1613 = vmatprep.mubr.f32.mxu0 %v3727_v0 }
  0x6d   :  { %1626 = vmatprep.subr.mxu0 %v1390_v31 }
  0x73   :  { %1617 = vmatmul.mubr.f32.vlgmr.msra.gmra.mrb[2].mxu0 %v124_v15 }
  0x74   :  { %1630 = vmatpush1.msra.mxu0 %v1396_v32  ;;  %1693 = vmatprep.mubr.f32.mxu0 %v3727_v0 }
  0x75   :  { %1702 = vmatprep.subr.mxu0 %v1310_v26 }
  0x7b   :  { %1695 = vmatmul.mubr.f32.vlgmr.msra.gmra.mrb[2].mxu0 %v2957_v8 }
  0x7c   :  { %1704 = vmatpush1.msra.mxu0 %v1312_v28  ;;  %1767 = vmatprep.mubr.f32.mxu0 %v3727_v0 }
  0x83   :  { %1769 = vmatmul.mubr.f32.vlgmr.msra.gmra.mrb[2].mxu0 %v2957_v8 }
  0x84   :  { %2109 = vmatprep.mubr.f32.mxu0 %v3727_v0 }
  0xa8   :  { %v43_v39 = vpop.permute.xlu0 %42 }
 0x106   :  { %v128_v37 = vpop.f32.mrb[0].mxu1 }
 0x107   :  { %v130_v38 = vpop.f32.mrb[1].mxu1  ;;  %v129_v40 = vadd.f32 %v128_v37, %v43_v39 }
 0x108   :  { %v131_v41 = vadd.f32 %v130_v38, %v43_v39 }
 0x12a   :  { %v515_v42 = vpop.f32.mrb[0].mxu0 }
 0x12b   :  { %v2750_v43 = vadd.f32 %v515_v42, %v129_v40  ;;  %v517_v44 = vpop.f32.mrb[1].mxu0 }
 0x12c   :  { %v2752_v45 = vadd.f32 %v517_v44, %v131_v41 }
 0x12d   :  { %v2981_v46 = vmax.f32 %v2750_v43, 0.0 }
 0x12e   :  { %v2987_v47 = vmax.f32 %v2752_v45, 0.0 }
 0x12f   :  { %535 = vrot.lane.b32.xlu1 %v2981_v46, %s2898_s1  ;;  %524 = vrot.lane.b32.xlu0 %v2981_v46, %s2899_s6  ;;  %v627_v60 = vand.u32 4294901760, %v2981_v46 }
 0x130   :  { %v625_v61 = vand.u32 4294901760, %v2987_v47 }
 0x131   :  { %v3052_v5 = vsub.f32 %v2981_v46, %v627_v60 }
 0x132   :  { %v3055_v6 = vsub.f32 %v2987_v47, %v625_v61 }
 0x133   :  { %544 = vrot.lane.b32.xlu1 %v2981_v46, %s2900_s7  ;;  %537 = vrot.lane.b32.xlu0 %v2987_v47, %s2898_s1  ;;  %v3720_v14 = vand.u32 4294901760, %v3052_v5 }
 0x134   :  { %v3724_v13 = vand.u32 4294901760, %v3055_v6 }
 0x135   :  { %v3089_v24 = vsub.f32 %v3052_v5, %v3720_v14 }
 0x136   :  { %v3084_v23 = vsub.f32 %v3055_v6, %v3724_v13 }
 0x137   :  { %553 = vrot.lane.b32.xlu1 %v2981_v46, %s2901_s8  ;;  %546 = vrot.lane.b32.xlu0 %v2987_v47, %s2900_s7  ;;  %v729_v37 = vand.u32 4294901760, %v3089_v24 }
 0x138   :  { %v723_v36 = vand.u32 4294901760, %v3084_v23 }
 0x13b   :  { %562 = vrot.lane.b32.xlu1 %v2981_v46, %s2902_s9  ;;  %555 = vrot.lane.b32.xlu0 %v2987_v47, %s2901_s8 }
 0x13f   :  { %526 = vrot.lane.b32.xlu1 %v2987_v47, %s2899_s6  ;;  %564 = vrot.lane.b32.xlu0 %v2987_v47, %s2902_s9 }
 0x143   :  { %571 = vrot.lane.b32.xlu1 %v2981_v46, %s2903_s10  ;;  %573 = vrot.lane.b32.xlu0 %v2987_v47, %s2903_s10 }
 0x147   :  { %580 = vrot.lane.b32.xlu1 %v2981_v46, %s2904_s11  ;;  %582 = vrot.lane.b32.xlu0 %v2987_v47, %s2904_s11 }
 0x14b   :  { %620 = vrot.lane.b32.xlu1 %v2952_v3, %s2905_s12  ;;  %589 = vrot.lane.b32.xlu0 %v2981_v46, %s2906_s13 }
 0x14f   :  { %591 = vrot.lane.b32.xlu1 %v2987_v47, %s2906_s13 }
 0x156   :  { %v1770_v48 = vpop.f32.mrb[2].mxu0 }
 0x157   :  { %v2755_v49 = vadd.f32 %v1770_v48, %v43_v39  ;;  %v1772_v50 = vpop.f32.mrb[3].mxu0 }
 0x158   :  { %v2756_v51 = vadd.f32 %v1772_v50, %v43_v39 }
 0x159   :  { %v3012_v52 = vmax.f32 %v2755_v49, 0.0 }
 0x15a   :  { %v3014_v53 = vmax.f32 %v2756_v51, 0.0 }
 0x15b   :  { %3775 = vst [vmem:[#allocation12_spill] sm:$0xff] %v3012_v52  ;;  %1779 = vrot.lane.b32.xlu0 %v3012_v52, %s2899_s6  ;;  %v3716_v1 = vand.u32 4294901760, %v3012_v52 }
 0x15c   :  { %3776 = vst [vmem:[#allocation13_spill] sm:$0xff] %v3014_v53  ;;  %1781 = vrot.lane.b32.xlu1 %v3014_v53, %s2899_s6  ;;  %v3717_v2 = vand.u32 4294901760, %v3014_v53 }
 0x15d   :  { %v3060_v9 = vsub.f32 %v3012_v52, %v3716_v1 }
 0x15e   :  { %v3065_v10 = vsub.f32 %v3014_v53, %v3717_v2 }
 0x15f   :  { %1787 = vrot.lane.b32.xlu0 %v3012_v52, %s2898_s1  ;;  %v3714_v19 = vand.u32 4294901760, %v3060_v9 }
 0x160   :  { %1789 = vrot.lane.b32.xlu1 %v3014_v53, %s2898_s1  ;;  %v3715_v18 = vand.u32 4294901760, %v3065_v10 }
 0x161   :  { %v3104_v32 = vsub.f32 %v3060_v9, %v3714_v19 }
 0x162   :  { %v3099_v31 = vsub.f32 %v3065_v10, %v3715_v18 }
 0x163   :  { %1795 = vrot.lane.b32.xlu0 %v3012_v52, %s2900_s7 }
 0x164   :  { %1797 = vrot.lane.b32.xlu1 %v3014_v53, %s2900_s7 }
 0x167   :  { %1803 = vrot.lane.b32.xlu0 %v3012_v52, %s2901_s8 }
 0x168   :  { %1805 = vrot.lane.b32.xlu1 %v3014_v53, %s2901_s8 }
 0x16b   :  { %1811 = vrot.lane.b32.xlu0 %v3012_v52, %s2902_s9 }
 0x16c   :  { %1813 = vrot.lane.b32.xlu1 %v3014_v53, %s2902_s9 }
 0x16f   :  { %1819 = vrot.lane.b32.xlu0 %v3012_v52, %s2903_s10 }
 0x170   :  { %1821 = vrot.lane.b32.xlu1 %v3014_v53, %s2903_s10 }
 0x173   :  { %1827 = vrot.lane.b32.xlu0 %v3012_v52, %s2904_s11 }
 0x174   :  { %1829 = vrot.lane.b32.xlu1 %v3014_v53, %s2904_s11 }
 0x177   :  { %1835 = vrot.lane.b32.xlu0 %v3012_v52, %s2906_s13 }
 0x178   :  { %1837 = vrot.lane.b32.xlu1 %v3014_v53, %s2906_s13 }
 0x1a1   :  { %v536_v54 = vpop.permute.xlu1 %535  ;;  %v525_v55 = vpop.permute.xlu0 %524 }
 0x1a5   :  { %v545_v57 = vpop.permute.xlu1 %544  ;;  %v538_v59 = vpop.permute.xlu0 %537 }
 0x1a6   :  { %v540_v4 = vsel %vm539_vm2, %v536_v54, %v538_v59  ;;  %v541_v12 = vsel %vm539_vm2, %v538_v59, %v536_v54 }
 0x1a7   :  { %v635_v11 = vand.u32 4294901760, %v540_v4  ;;  %v633_v20 = vand.u32 4294901760, %v541_v12 }
 0x1a9   :  { %v554_v62 = vpop.permute.xlu1 %553  ;;  %v547_v63 = vpop.permute.xlu0 %546  ;;  %v3077_v21 = vsub.f32 %v540_v4, %v635_v11  ;;  %v3106_v33 = vsub.f32 %v541_v12, %v633_v20 }
 0x1aa   :  { %v550_v25 = vsel %vm548_vm4, %v547_v63, %v545_v57  ;;  %v549_v29 = vsel %vm548_vm4, %v545_v57, %v547_v63 }
 0x1ab   :  { %3777 = vst [vmem:[#allocation14_spill] sm:$0xff] %v3106_v33  ;;  %v3718_v34 = vand.u32 4294901760, %v3077_v21  ;;  %v637_v35 = vand.u32 4294901760, %v550_v25  ;;  %v639_v38 = vand.u32 4294901760, %v549_v29  ;;  %v3719_v46 = vand.u32 4294901760, %v3106_v33 }
 0x1ad   :  { %v563_v7 = vpop.permute.xlu1 %562  ;;  %v556_v8 = vpop.permute.xlu0 %555  ;;  %v3127_v47 = vsub.f32 %v3077_v21, %v3718_v34  ;;  %v3140_v56 = vpack.c.bf16 %v639_v38, %v635_v11  ;;  %v3142_v57 = vsub.f32 %v550_v25, %v637_v35 }
 0x1ae   :  { %v558_v48 = vsel %vm557_vm6, %v554_v62, %v556_v8  ;;  %v559_v49 = vsel %vm557_vm6, %v556_v8, %v554_v62  ;;  %v3149_v62 = vsub.f32 %v549_v29, %v639_v38 }
 0x1af   :  { %3778 = vst [vmem:[#allocation15_spill] sm:$0xff] %v3142_v57  ;;  %v641_v63 = vand.u32 4294901760, %v559_v49  ;;  %v643_v4 = vand.u32 4294901760, %v558_v48  ;;  %v3722_v25 = vand.u32 4294901760, %v3142_v57 }
 0x1b0   :  { %v3725_v1 = vand.u32 4294901760, %v3149_v62 }
 0x1b1   :  { %v527_v15 = vpop.permute.xlu1 %526  ;;  %v565_v16 = vpop.permute.xlu0 %564 }
 0x1b2   :  { %v531_v17 = vsel %vm530_vm3, %v525_v55, %v527_v15  ;;  %v532_v22 = vsel %vm530_vm3, %v527_v15, %v525_v55  ;;  %v568_v40 = vsel %vm566_vm5, %v565_v16, %v563_v7  ;;  %v567_v51 = vsel %vm566_vm5, %v563_v7, %v565_v16 }
 0x1b3   :  { %v631_v26 = vand.u32 4294901760, %v531_v17  ;;  %v629_v30 = vand.u32 4294901760, %v532_v22  ;;  %v645_v54 = vand.u32 4294901760, %v568_v40  ;;  %v3138_v55 = vpack.c.bf16 %v637_v35, %v633_v20 }
 0x1b4   :  { %v647_v8 = vand.u32 4294901760, %v567_v51  ;;  %v764_v44 = vsub.f32 %v3149_v62, %v3725_v1 }
 0x1b5   :  { %v572_v27 = vpop.permute.xlu1 %571  ;;  %v574_v28 = vpop.permute.xlu0 %573  ;;  %v3114_v39 = vpack.c.bf16 %v631_v26, %v627_v60  ;;  %v3118_v42 = vpack.c.bf16 %v629_v30, %v625_v61  ;;  %v3133_v50 = vsub.f32 %v532_v22, %v629_v30  ;;  %v3144_v59 = vsub.f32 %v531_v17, %v631_v26 }
 0x1b6   :  { %v576_v11 = vsel %vm575_vm7, %v572_v27, %v574_v28  ;;  %v577_v12 = vsel %vm575_vm7, %v574_v28, %v572_v27  ;;  %v3162_v22 = vpack.c.bf16 %v645_v54, %v641_v63  ;;  %v3173_v28 = vsub.f32 %v3106_v33, %v3719_v46 }
 0x1b7   :  { %2558 = vmatprep.subr.bf16.mxu1 %v3118_v42  ;;  %v3723_v16 = vand.u32 4294901760, %v3133_v50  ;;  %v3721_v26 = vand.u32 4294901760, %v3144_v59  ;;  %v3175_v30 = vsub.f32 %v558_v48, %v643_v4  ;;  %v3177_v35 = vsub.f32 %v568_v40, %v645_v54 }
 0x1b8   :  { %2560 = vmatpush1.bf16.msra.mxu1 %v3114_v39  ;;  %v649_v38 = vand.u32 4294901760, %v577_v12  ;;  %v3188_v48 = vsub.f32 %v559_v49, %v641_v63  ;;  %v3198_v2 = vsub.f32 %v567_v51, %v647_v8  ;;  %v758_v49 = vsub.f32 %v3142_v57, %v3722_v25 }
 0x1b9   :  { %v581_v41 = vpop.permute.xlu1 %580  ;;  %v583_v43 = vpop.permute.xlu0 %582  ;;  %2562 = vmatprep.subr.bf16.mxu1 %v3138_v55  ;;  %v734_v54 = vsub.f32 %v3133_v50, %v3723_v16  ;;  %v3726_v63 = vand.u32 4294901760, %v3177_v35  ;;  %v765_v0 = vand.u32 4294901760, %v764_v44 }
 0x1ba   :  { %v586_v60 = vsel %vm584_vm8, %v583_v43, %v581_v41  ;;  %v585_v17 = vsel %vm584_vm8, %v581_v41, %v583_v43  ;;  %v651_v41 = vand.u32 4294901760, %v576_v11  ;;  %v3734_v25 = vand.u32 4294901760, %v3188_v48 }
 0x1bb   :  { %v653_v20 = vand.u32 4294901760, %v586_v60  ;;  %v655_v19 = vand.u32 4294901760, %v585_v17  ;;  %v735_v13 = vand.u32 4294901760, %v734_v54 }
 0x1bc   :  { %2564 = vmatpush1.bf16.msra.mxu1 %v3140_v56  ;;  %v3207_v46 = vsub.f32 %v576_v11, %v651_v41 }
 0x1bd   :  { %v621_v61 = vpop.permute.xlu1 %620  ;;  %v590_v43 = vpop.permute.xlu0 %589  ;;  %2566 = vmatprep.subr.bf16.mxu1 %v3162_v22  ;;  %v3190_v40 = vpack.c.bf16 %v653_v20, %v649_v38  ;;  %v3200_v34 = vsub.f32 %v586_v60, %v653_v20  ;;  %v753_v60 = vand.u32 4294901760, %v3127_v47  ;;  %v3216_v20 = vsub.f32 %v577_v12, %v649_v38 }
 0x1be   :  { %v623_v7 = vsel %vm622_vm9, %v621_v61, 0  ;;  %v3180_v61 = vpack.c.bf16 %v647_v8, %v643_v4  ;;  %v740_v4 = vsub.f32 %v3144_v59, %v3721_v26  ;;  %v3729_v8 = vand.u32 4294901760, %v3175_v30 }
 0x1bf   :  { %v3157_v15 = vand.u32 4294901760, %v623_v7  ;;  %3779 = vst [vmem:[#allocation16_spill] sm:$0xff] %v3200_v34  ;;  %v3218_v26 = vpack.c.bf16 %v655_v19, %v651_v41  ;;  %v3221_v16 = vsub.f32 %v585_v17, %v655_v19  ;;  %v3732_v47 = vand.u32 4294901760, %v3198_v2 }
 0x1c0   :  { %2568 = vmatpush1.bf16.msra.mxu1 %v3180_v61  ;;  %v741_v45 = vand.u32 4294901760, %v740_v4  ;;  %v3731_v12 = vand.u32 4294901760, %v3200_v34  ;;  %v3730_v38 = vand.u32 4294901760, %v3207_v46  ;;  %v759_v17 = vand.u32 4294901760, %v758_v49 }
 0x1c1   :  { %v3168_v29 = vsub.f32 %v623_v7, %v3157_v15  ;;  %v592_v27 = vpop.permute.xlu1 %591  ;;  %2570 = vmatprep.subr.bf16.mxu1 %v3190_v40  ;;  %v776_v41 = vsub.f32 %v3175_v30, %v3729_v8  ;;  %v2573_v1 = vpack.c.bf16 %v735_v13, %v723_v36  ;;  %v770_v49 = vsub.f32 %v3188_v48, %v3734_v25 }
 0x1c2   :  { %v595_v18 = vsel %vm593_vm10, %v592_v27, %v590_v43  ;;  %v594_v11 = vsel %vm593_vm10, %v590_v43, %v592_v27  ;;  %v782_v27 = vsub.f32 %v3177_v35, %v3726_v63  ;;  %v3733_v43 = vand.u32 4294901760, %v3216_v20 }
 0x1c3   :  { %v3183_v7 = vand.u32 4294901760, %v3168_v29  ;;  %v3209_v14 = vand.u32 4294901760, %v595_v18  ;;  %v3242_v54 = vand.u32 4294901760, %v594_v11  ;;  %v2907_v63 = vmov 77  }
 0x1c4   :  { %2572 = vmatpush1.bf16.msra.mxu1 %v3218_v26  ;;  %2817 = vset.pattern.permute.xlu0 %v2907_v63  ;;  %v788_v8 = vsub.f32 %v3198_v2, %v3732_v47  ;;  %v2575_v4 = vpack.c.bf16 %v741_v45, %v729_v37  ;;  %v806_v13 = vsub.f32 %v3200_v34, %v3731_v12  ;;  %v783_v37 = vand.u32 4294901760, %v782_v27 }
 0x1c5   :  { %v711_v51 = vsub.f32 %v3168_v29, %v3183_v7  ;;  %658 = vmatprep.subr.mxu1 %v3209_v14  ;;  %617 = vperm.xlu0 %2817, %v2952_v3   ;;  %v800_v36 = vsub.f32 %v3207_v46, %v3730_v38  ;;  %v3265_v44 = vsub.f32 %v595_v18, %v3209_v14  ;;  %v777_v45 = vand.u32 4294901760, %v776_v41 }
 0x1c6   :  { %v794_v18 = vsub.f32 %v3216_v20, %v3733_v43  ;;  %v789_v38 = vand.u32 4294901760, %v788_v8  ;;  %v807_v47 = vand.u32 4294901760, %v806_v13 }
 0x1c7   :  { %v3233_v19 = vand.u32 4294901760, %v711_v51  ;;  %v747_v51 = vand.u32 4294901760, %v3173_v28 }
 0x1c8   :  { %660 = vmatpush1.msra.mxu1 %v3242_v54 }
 0x1c9   :  { %3780 = vst [vmem:[#allocation17_spill] sm:$0xff] %v3233_v19  ;;  %2574 = vmatprep.subr.bf16.mxu1 %v2573_v1  ;;  %713 = vmatmul.mubr.f32.vlgmr.msra.gmra.mrb[2].mxu1 %v3233_v19  ;;  %v2577_v28 = vpack.c.bf16 %v759_v17, %v747_v51  ;;  %v3783_v1 = vmov 0.0   ;;  %v3784_v17 = vand.u32 4294901760, %v3221_v16  ;;  %v771_v51 = vand.u32 4294901760, %v770_v49 }
 0x1ca   :  { %2576 = vmatpush1.bf16.msra.mxu1 %v2575_v4  ;;  %873 = vmatprep.mubr.f32.mxu1 %v3783_v1  ;;  %v801_v49 = vand.u32 4294901760, %v800_v36 }
 0x1cb   :  { %v812_v27 = vsub.f32 %v3221_v16, %v3784_v17  ;;  %2578 = vmatprep.subr.bf16.mxu1 %v2577_v28  ;;  %v2581_v17 = vpack.c.bf16 %v783_v37, %v771_v51 }
 0x1cd   :  { %v1780_v23 = vpop.permute.xlu0 %1779  ;;  %v813_v13 = vand.u32 4294901760, %v812_v27  ;;  %v3787_v27 = vand.u32 4294901760, %v3265_v44 }
 0x1ce   :  { %v1782_v24 = vpop.permute.xlu1 %1781 }
 0x1cf   :  { %v3270_v63 = vsel %vm530_vm3, %v1780_v23, %v1782_v24  ;;  %v3274_v3 = vsel %vm530_vm3, %v1782_v24, %v1780_v23  ;;  %v3286_v23 = vsub.f32 %v594_v11, %v3242_v54  ;;  %v2579_v24 = vpack.c.bf16 %v765_v0, %v753_v60 }
 0x1d0   :  { %3781 = vst [vmem:[#allocation18_spill] sm:$0xff] %v3270_v63  ;;  %3782 = vst [vmem:[#allocation19_spill] sm:$0xff] %v3274_v3  ;;  %v3735_v41 = vand.u32 4294901760, %v3274_v3  ;;  %v3736_v4 = vand.u32 4294901760, %v3270_v63  ;;  %v795_v11 = vand.u32 4294901760, %v794_v18 }
 0x1d1   :  { %v1788_v12 = vpop.permute.xlu0 %1787  ;;  %2580 = vmatpush1.bf16.msra.mxu1 %v2579_v24  ;;  %v3744_v36 = vand.u32 4294901760, %v3286_v23  ;;  %v2583_v24 = vpack.c.bf16 %v789_v38, %v777_v45 }
 0x1d2   :  { %v3291_v43 = vsub.f32 %v3274_v3, %v3735_v41  ;;  %v3296_v28 = vsub.f32 %v3270_v63, %v3736_v4  ;;  %v1790_v25 = vpop.permute.xlu1 %1789  ;;  %2582 = vmatprep.subr.bf16.mxu1 %v2581_v17  ;;  %v2585_v8 = vpack.c.bf16 %v807_v47, %v795_v11  ;;  %v818_v17 = vsub.f32 %v3265_v44, %v3787_v27 }
 0x1d3   :  { %v3301_v0 = vsel %vm539_vm2, %v1788_v12, %v1790_v25  ;;  %v3305_v60 = vsel %vm539_vm2, %v1790_v25, %v1788_v12  ;;  %v2593_v27 = vpack.c.bf16 %v3142_v57, %v3106_v33 }
 0x1d4   :  { %3785 = vst [vmem:[#allocation20_spill] sm:$0xff] %v3301_v0  ;;  %3786 = vst [vmem:[#allocation21_spill] sm:$0xff] %v3305_v60  ;;  %v3739_v41 = vand.u32 4294901760, %v3291_v43  ;;  %v3738_v4 = vand.u32 4294901760, %v3296_v28  ;;  %v3740_v37 = vand.u32 4294901760, %v3305_v60  ;;  %v3741_v51 = vand.u32 4294901760, %v3301_v0 }
 0x1d5   :  { %v1796_v19 = vpop.permute.xlu0 %1795  ;;  %2584 = vmatpush1.bf16.msra.mxu1 %v2583_v24  ;;  %v824_v24 = vsub.f32 %v3286_v23, %v3744_v36  ;;  %v3790_v36 = vand.u32 4294901760, %v3104_v32 }
 0x1d6   :  { %v1976_v25 = vsub.f32 %v3296_v28, %v3738_v4  ;;  %v3318_v12 = vsub.f32 %v3305_v60, %v3740_v37  ;;  %v1798_v18 = vpop.permute.xlu1 %1797  ;;  %v1970_v38 = vsub.f32 %v3291_v43, %v3739_v41  ;;  %v3329_v47 = vsub.f32 %v3301_v0, %v3741_v51  ;;  %2586 = vmatprep.subr.bf16.mxu1 %v2585_v8 }
 0x1d7   :  { %v3333_v45 = vsel %vm548_vm4, %v1796_v19, %v1798_v18  ;;  %v3337_v11 = vsel %vm548_vm4, %v1798_v18, %v1796_v19  ;;  %v2587_v51 = vpack.c.bf16 %v813_v13, %v801_v49  ;;  %v819_v49 = vand.u32 4294901760, %v818_v17 }
 0x1d8   :  { %3788 = vst [vmem:[#allocation22_spill] sm:$0xff] %v3333_v45  ;;  %3789 = vst [vmem:[#allocation23_spill] sm:$0xff] %v3337_v11  ;;  %v1977_v4 = vand.u32 4294901760, %v1976_v25  ;;  %v3747_v41 = vand.u32 4294901760, %v3337_v11  ;;  %v3749_v37 = vand.u32 4294901760, %v3333_v45  ;;  %v1981_v0 = vand.u32 4294901760, %v3318_v12 }
 0x1d9   :  { %v1987_v60 = vand.u32 4294901760, %v3329_v47  ;;  %v1804_v19 = vpop.permute.xlu0 %1803  ;;  %v1971_v18 = vand.u32 4294901760, %v1970_v38  ;;  %2588 = vmatpush1.bf16.msra.mxu1 %v2587_v51  ;;  %v2591_v17 = vpack.c.bf16 %v3144_v59, %v3052_v5 }
 0x1da   :  { %v3351_v25 = vsub.f32 %v3337_v11, %v3747_v41  ;;  %v3356_v8 = vsub.f32 %v3333_v45, %v3749_v37  ;;  %v1806_v13 = vpop.permute.xlu1 %1805  ;;  %v2671_v63 = vpack.c.bf16 %v1977_v4, %v3790_v36  ;;  %v3793_v11 = vand.u32 4294901760, %v3099_v31  ;;  %820 = vmatprep.subr.mxu1 %v819_v49 }
 0x1db   :  { %v1988_v52 = vsub.f32 %v3329_v47, %v1987_v60  ;;  %v3363_v38 = vsel %vm557_vm6, %v1804_v19, %v1806_v13  ;;  %v3367_v41 = vsel %vm557_vm6, %v1806_v13, %v1804_v19  ;;  %v825_v45 = vand.u32 4294901760, %v824_v24 }
 0x1dc   :  { %3791 = vst [vmem:[#allocation24_spill] sm:$0xff] %v3363_v38  ;;  %3792 = vst [vmem:[#allocation25_spill] sm:$0xff] %v3367_v41  ;;  %v2669_v37 = vpack.c.bf16 %v1971_v18, %v3793_v11  ;;  %v1993_v32 = vand.u32 4294901760, %v3351_v25  ;;  %v1999_v4 = vand.u32 4294901760, %v3356_v8  ;;  %v3753_v36 = vand.u32 4294901760, %v3367_v41 }
 0x1dd   :  { %v2589_v19 = vpack.c.bf16 %v3133_v50, %v3055_v6  ;;  %v1812_v13 = vpop.permute.xlu0 %1811  ;;  %v1982_v31 = vsub.f32 %v3318_v12, %v1981_v0  ;;  %v1989_v11 = vand.u32 4294901760, %v1988_v52  ;;  %v3794_v24 = vand.u32 4294901760, %v3363_v38  ;;  %826 = vmatpush1.msra.mxu1 %v825_v45 }
 0x1de   :  { %2670 = vmatprep.subr.bf16.mxu0 %v2669_v37  ;;  %v2000_v18 = vsub.f32 %v3356_v8, %v1999_v4  ;;  %v3384_v3 = vsub.f32 %v3367_v41, %v3753_v36  ;;  %v1814_v49 = vpop.permute.xlu1 %1813  ;;  %v1994_v51 = vsub.f32 %v3351_v25, %v1993_v32  ;;  %875 = vmatmul.mubr.f32.vlgmr.msra.gmra.mrb[2].mxu1 %v3157_v15 }
 0x1df   :  { %2672 = vmatpush1.bf16.msra.mxu0 %v2671_v63  ;;  %v3390_v53 = vsub.f32 %v3363_v38, %v3794_v24  ;;  %v3394_v52 = vsel %vm566_vm5, %v1812_v13, %v1814_v49  ;;  %v3398_v37 = vsel %vm566_vm5, %v1814_v49, %v1812_v13  ;;  %v1983_v36 = vand.u32 4294901760, %v1982_v31  ;;  %2590 = vmatprep.subr.bf16.mxu1 %v2589_v19 }
 0x1e0   :  { %3795 = vst [vmem:[#allocation26_spill] sm:$0xff] %v3394_v52  ;;  %3796 = vst [vmem:[#allocation27_spill] sm:$0xff] %v3398_v37  ;;  %v2001_v41 = vand.u32 4294901760, %v2000_v18  ;;  %v3759_v57 = vand.u32 4294901760, %v3398_v37  ;;  %v3758_v24 = vand.u32 4294901760, %v3394_v52  ;;  %2592 = vmatpush1.bf16.msra.mxu1 %v2591_v17  ;;  %v1995_v33 = vand.u32 4294901760, %v1994_v51  ;;  %981 = vmatprep.mubr.f32.mxu1 %v3783_v1 }
 0x1e1   :  { %v3760_v45 = vand.u32 4294901760, %v3390_v53  ;;  %v1820_v38 = vpop.permute.xlu0 %1819  ;;  %v3406_v13 = vpack.c.bf16 %v1993_v32, %v1981_v0  ;;  %v3408_v31 = vpack.c.bf16 %v1999_v4, %v1987_v60  ;;  %v2595_v18 = vpack.c.bf16 %v3149_v62, %v3077_v21  ;;  %2594 = vmatprep.subr.bf16.mxu1 %v2593_v27 }
 0x1e2   :  { %v3415_v19 = vsub.f32 %v3398_v37, %v3759_v57  ;;  %v3420_v17 = vsub.f32 %v3394_v52, %v3758_v24  ;;  %v1822_v51 = vpop.permute.xlu1 %1821  ;;  %v2675_v49 = vpack.c.bf16 %v2001_v41, %v1989_v11  ;;  %v2597_v0 = vpack.c.bf16 %v3177_v35, %v3188_v48 }
 0x1e3   :  { %3797 = vst [vmem:[#allocation28_spill] sm:$0xff] %v3406_v13  ;;  %3798 = vst [vmem:[#allocation29_spill] sm:$0xff] %v3408_v31  ;;  %v3426_v60 = vsel %vm575_vm7, %v1820_v38, %v1822_v51  ;;  %v3430_v27 = vsel %vm575_vm7, %v1822_v51, %v1820_v38  ;;  %v2673_v32 = vpack.c.bf16 %v1995_v33, %v1983_v36  ;;  %v3801_v33 = vand.u32 4294901760, %v3384_v3 }
 0x1e4   :  { %3799 = vst [vmem:[#allocation30_spill] sm:$0xff] %v3426_v60  ;;  %3800 = vst [vmem:[#allocation31_spill] sm:$0xff] %v3430_v27  ;;  %v2012_v4 = vsub.f32 %v3390_v53, %v3760_v45  ;;  %v3763_v24 = vand.u32 4294901760, %v3415_v19  ;;  %v3761_v41 = vand.u32 4294901760, %v3420_v17  ;;  %v3762_v11 = vand.u32 4294901760, %v3430_v27  ;;  %2596 = vmatpush1.bf16.msra.mxu1 %v2595_v18 }
 0x1e5   :  { %v2599_v57 = vpack.c.bf16 %v3198_v2, %v3175_v30  ;;  %v3764_v63 = vand.u32 4294901760, %v3426_v60  ;;  %2674 = vmatprep.subr.bf16.mxu0 %v2673_v32  ;;  %v1828_v38 = vpop.permute.xlu0 %1827  ;;  %v2006_v36 = vsub.f32 %v3384_v3, %v3801_v33  ;;  %2598 = vmatprep.subr.bf16.mxu1 %v2597_v0 }
 0x1e6   :  { %v2024_v51 = vsub.f32 %v3420_v17, %v3761_v41  ;;  %v3450_v45 = vsub.f32 %v3430_v27, %v3762_v11  ;;  %2676 = vmatpush1.bf16.msra.mxu0 %v2675_v49  ;;  %v1830_v18 = vpop.permute.xlu1 %1829  ;;  %v2018_v32 = vsub.f32 %v3415_v19, %v3763_v24  ;;  %v2601_v41 = vpack.c.bf16 %v3200_v34, %v3216_v20 }
 0x1e7   :  { %v3458_v33 = vsub.f32 %v3426_v60, %v3764_v63  ;;  %v3464_v0 = vsel %vm584_vm8, %v1828_v38, %v1830_v18  ;;  %v3468_v49 = vsel %vm584_vm8, %v1830_v18, %v1828_v38  ;;  %v2013_v11 = vand.u32 4294901760, %v2012_v4 }
 0x1e8   :  { %3802 = vst [vmem:[#allocation32_spill] sm:$0xff] %v3468_v49  ;;  %v2025_v31 = vand.u32 4294901760, %v2024_v51  ;;  %v3770_v24 = vand.u32 4294901760, %v3468_v49  ;;  %v3772_v13 = vand.u32 4294901760, %v3464_v0  ;;  %2600 = vmatpush1.bf16.msra.mxu1 %v2599_v57  ;;  %v2007_v52 = vand.u32 4294901760, %v2006_v36 }
 0x1e9   :  { %v3773_v60 = vand.u32 4294901760, %v3458_v33  ;;  %v1836_v27 = vpop.permute.xlu0 %1835  ;;  %v2019_v37 = vand.u32 4294901760, %v2018_v32  ;;  %v2603_v34 = vpack.c.bf16 %v3221_v16, %v3207_v46  ;;  %2602 = vmatprep.subr.bf16.mxu1 %v2601_v41 }
 0x1ea   :  { %v3479_v4 = vsub.f32 %v3468_v49, %v3770_v24  ;;  %v3484_v38 = vsub.f32 %v3464_v0, %v3772_v13  ;;  %v1838_v51 = vpop.permute.xlu1 %1837  ;;  %v2679_v18 = vpack.c.bf16 %v2025_v31, %v2013_v11  ;;  %v3803_v31 = vand.u32 4294901760, %v3450_v45 }
 0x1eb   :  { %v2036_v57 = vsub.f32 %v3458_v33, %v3773_v60  ;;  %v1839_v36 = vsel %vm593_vm10, %v1836_v27, %v1838_v51  ;;  %v1840_v41 = vsel %vm593_vm10, %v1838_v51, %v1836_v27  ;;  %v2677_v32 = vpack.c.bf16 %v2019_v37, %v2007_v52 }
 0x1ec   :  { %v2041_v24 = vand.u32 4294901760, %v3479_v4  ;;  %v3774_v63 = vand.u32 4294901760, %v3484_v38  ;;  %v3495_v49 = vand.u32 4294901760, %v1840_v41  ;;  %2604 = vmatpush1.bf16.msra.mxu1 %v2603_v34  ;;  %v3497_v13 = vand.u32 4294901760, %v1839_v36 }
 0x1ed   :  { %2678 = vmatprep.subr.bf16.mxu0 %v2677_v32  ;;  %v2030_v11 = vsub.f32 %v3450_v45, %v3803_v31  ;;  %931 = vmatprep.subr.mxu1 %v3265_v44  ;;  %v2037_v37 = vand.u32 4294901760, %v2036_v57 }
 0x1ee   :  { %v2048_v58 = vsub.f32 %v3484_v38, %v3774_v63  ;;  %v3507_v52 = vsub.f32 %v1840_v41, %v3495_v49  ;;  %2680 = vmatpush1.bf16.msra.mxu0 %v2679_v18  ;;  %v2042_v34 = vsub.f32 %v3479_v4, %v2041_v24  ;;  %v3513_v27 = vsub.f32 %v1839_v36, %v3497_v13 }
 0x1ef   :  { %v2031_v32 = vand.u32 4294901760, %v2030_v11 }
 0x1f0   :  { %v2049_v51 = vand.u32 4294901760, %v2048_v58  ;;  %v2043_v31 = vand.u32 4294901760, %v2042_v34  ;;  %v2053_v60 = vand.u32 4294901760, %v3507_v52  ;;  %v2059_v63 = vand.u32 4294901760, %v3513_v27  ;;  %934 = vmatpush1.msra.mxu1 %v3286_v23 }
 0x1f1   :  { %984 = vmatmul.mubr.f32.vlgmr.msra.gmra.mrb[2].mxu1 %v3168_v29  ;;  %2606 = vmatprep.subr.bf16.mxu1 %v3118_v42  ;;  %v2685_v34 = vpack.c.bf16 %v3291_v43, %v3065_v10 }
 0x1f2   :  { %v2681_v18 = vpack.c.bf16 %v2043_v31, %v2031_v32  ;;  %v2683_v41 = vpack.c.bf16 %v2049_v51, %v2037_v37  ;;  %v2054_v57 = vsub.f32 %v3507_v52, %v2053_v60  ;;  %v2060_v36 = vsub.f32 %v3513_v27, %v2059_v63  ;;  %2608 = vmatpush1.bf16.msra.mxu1 %v3114_v39 }
 0x1f3   :  { %1072 = vmatprep.mubr.f32.mxu1 %v3783_v1  ;;  %2610 = vmatprep.subr.bf16.mxu1 %v3138_v55  ;;  %v2687_v37 = vpack.c.bf16 %v3296_v28, %v3060_v9  ;;  %v2689_v51 = vpack.c.bf16 %v3351_v25, %v3318_v12  ;;  %v2691_v32 = vpack.c.bf16 %v3356_v8, %v3329_v47  ;;  %v3804_v25 = vand.u32 4294901760, %v3055_v6  ;;  %v3810_v6 = vld [vmem:[#allocation15_spill] sm:$0xff] }
 0x1f4   :  { %2682 = vmatprep.subr.bf16.mxu0 %v2681_v18  ;;  %v2055_v11 = vand.u32 4294901760, %v2054_v57  ;;  %v2061_v58 = vand.u32 4294901760, %v2060_v36  ;;  %v2693_v31 = vpack.c.bf16 %v3415_v19, %v3384_v3  ;;  %v2695_v12 = vpack.c.bf16 %v3420_v17, %v3390_v53 }
 0x1f5   :  { %2684 = vmatpush1.bf16.msra.mxu0 %v2683_v41  ;;  %v3805_v18 = vand.u32 4294901760, %v3133_v50  ;;  %v3806_v47 = vand.u32 4294901760, %v3052_v5  ;;  %v3807_v8 = vand.u32 4294901760, %v3144_v59  ;;  %v2697_v36 = vpack.c.bf16 %v3479_v4, %v3450_v45 }
 0x1f6   :  { %2056 = vmatprep.subr.mxu0 %v2055_v11  ;;  %2612 = vmatpush1.bf16.msra.mxu1 %v3140_v56  ;;  %v3808_v11 = vld [vmem:[#allocation14_spill] sm:$0xff]  ;;  %v3812_v5 = vand.u32 4294901760, %v3077_v21  ;;  %v3813_v59 = vand.u32 4294901760, %v3149_v62  ;;  %v3820_v21 = vld [vmem:[#allocation12_spill] sm:$0xff] }
 0x1f7   :  { %2614 = vmatprep.subr.bf16.mxu1 %v3162_v22  ;;  %v2621_v41 = vpack.c.bf16 %v3805_v18, %v3804_v25  ;;  %v2623_v57 = vpack.c.bf16 %v3807_v8, %v3806_v47  ;;  %v3816_v25 = vld [vmem:[#allocation13_spill] sm:$0xff]  ;;  %v3822_v62 = vld [vmem:[#allocation18_spill] sm:$0xff] }
 0x1f8   :  { %v3817_v18 = vand.u32 4294901760, %v3816_v25 }
 0x1f9   :  { %2062 = vmatpush1.msra.mxu0 %v2061_v58  ;;  %v3809_v58 = vand.u32 4294901760, %v3808_v11 }
 0x1fa   :  { %2111 = vmatmul.mubr.f32.vlgmr.msra.gmra.mrb[4].mxu0 %v3157_v15  ;;  %2686 = vmatprep.subr.bf16.mxu0 %v2685_v34  ;;  %v3811_v34 = vand.u32 4294901760, %v3810_v6  ;;  %v3826_v6 = vand.u32 4294901760, %v3216_v20  ;;  %v3835_v20 = vld [vmem:[#allocation22_spill] sm:$0xff] }
 0x1fb   :  { %2616 = vmatpush1.bf16.msra.mxu1 %v3180_v61  ;;  %2688 = vmatpush1.bf16.msra.mxu0 %v2687_v37  ;;  %v2699_v37 = vpack.c.bf16 %v3484_v38, %v3458_v33 }
 0x1fc   :  { %2618 = vmatprep.subr.bf16.mxu1 %v3190_v40  ;;  %2690 = vmatprep.subr.bf16.mxu0 %v2689_v51  ;;  %v2625_v50 = vpack.c.bf16 %v3811_v34, %v3809_v58  ;;  %v2627_v51 = vpack.c.bf16 %v3813_v59, %v3812_v5  ;;  %v3827_v34 = vld [vmem:[#allocation16_spill] sm:$0xff]  ;;  %v3829_v5 = vld [vmem:[#allocation21_spill] sm:$0xff] }
 0x1fd   :  { %2217 = vmatprep.mubr.f32.mxu0 %v3783_v1  ;;  %v3830_v59 = vand.u32 4294901760, %v3829_v5  ;;  %v3851_v5 = vld [vmem:[#allocation32_spill] sm:$0xff] }
 0x1ff   :  { %2620 = vmatpush1.bf16.msra.mxu1 %v3218_v26  ;;  %2692 = vmatpush1.bf16.msra.mxu0 %v2691_v32  ;;  %v3814_v32 = vand.u32 4294901760, %v3188_v48  ;;  %v3824_v48 = vand.u32 4294901760, %v3175_v30 }
 0x200   :  { %1023 = vmatprep.subr.mxu1 %v3209_v14  ;;  %2694 = vmatprep.subr.bf16.mxu0 %v2693_v31  ;;  %v3815_v31 = vand.u32 4294901760, %v3177_v35  ;;  %v3825_v35 = vand.u32 4294901760, %v3198_v2  ;;  %v3833_v2 = vld [vmem:[#allocation20_spill] sm:$0xff] }
 0x201   :  { %v3834_v30 = vand.u32 4294901760, %v3833_v2  ;;  %v3855_v2 = vand.u32 4294901760, %v3464_v0 }
 0x202   :  { %v2631_v58 = vpack.c.bf16 %v3825_v35, %v3824_v48  ;;  %v3843_v48 = vand.u32 4294901760, %v3265_v44  ;;  %v3844_v35 = vld [vmem:[#allocation24_spill] sm:$0xff]  ;;  %v3853_v44 = vld [vmem:[#allocation30_spill] sm:$0xff] }
 0x203   :  { %1025 = vmatpush1.msra.mxu1 %v3242_v54  ;;  %2696 = vmatpush1.bf16.msra.mxu0 %v2695_v12  ;;  %v2629_v12 = vpack.c.bf16 %v3815_v31, %v3814_v32 }
 0x204   :  { %1076 = vmatmul.mubr.f32.vlgmr.msra.gmra.mrb[2].mxu1 %v3183_v7  ;;  %2622 = vmatprep.subr.bf16.mxu1 %v2621_v41  ;;  %v3818_v41 = vld [vmem:[#allocation19_spill] sm:$0xff] }
 0x205   :  { %2624 = vmatpush1.bf16.msra.mxu1 %v2623_v57  ;;  %2698 = vmatprep.subr.bf16.mxu0 %v2697_v36  ;;  %v3819_v47 = vand.u32 4294901760, %v3818_v41  ;;  %v3821_v57 = vand.u32 4294901760, %v3820_v21  ;;  %v3823_v36 = vand.u32 4294901760, %v3822_v62 }
 0x206   :  { %2626 = vmatprep.subr.bf16.mxu1 %v2625_v50  ;;  %1200 = vmatprep.mubr.f32.mxu1 %v3783_v1  ;;  %v3828_v50 = vand.u32 4294901760, %v3827_v34 }
 0x207   :  { %2700 = vmatpush1.bf16.msra.mxu0 %v2699_v37  ;;  %v3581_v8 = vpack.c.bf16 %v3819_v47, %v3817_v18  ;;  %v3587_v11 = vpack.c.bf16 %v3823_v36, %v3821_v57  ;;  %v3838_v18 = vand.u32 4294901760, %v3221_v16  ;;  %v3839_v47 = vld [vmem:[#allocation25_spill] sm:$0xff]  ;;  %v3841_v57 = vld [vmem:[#allocation27_spill] sm:$0xff]  ;;  %v3848_v16 = vand.u32 4294901760, %v3286_v23 }
 0x208   :  { %2167 = vmatprep.subr.mxu0 %v3507_v52  ;;  %v2633_v37 = vpack.c.bf16 %v3828_v50, %v3826_v6  ;;  %v3840_v21 = vand.u32 4294901760, %v3839_v47  ;;  %v3842_v62 = vand.u32 4294901760, %v3841_v57  ;;  %v3846_v6 = vld [vmem:[#allocation26_spill] sm:$0xff]  ;;  %v3849_v50 = vld [vmem:[#allocation31_spill] sm:$0xff]  ;;  %v3857_v23 = vand.u32 4294901760, %v3291_v43  ;;  %v3863_v43 = vld [vmem:[#allocation29_spill] sm:$0xff] }
 0x209   :  { %2628 = vmatpush1.bf16.msra.mxu1 %v2627_v51  ;;  %v3831_v51 = vld [vmem:[#allocation23_spill] sm:$0xff] }
 0x20a   :  { %2630 = vmatprep.subr.bf16.mxu1 %v2629_v12  ;;  %v3832_v32 = vand.u32 4294901760, %v3831_v51  ;;  %v3836_v12 = vand.u32 4294901760, %v3835_v20  ;;  %v2661_v36 = vpack.c.bf16 %v3842_v62, %v3840_v21 }
 0x20b   :  { %2170 = vmatpush1.msra.mxu0 %v3513_v27 }
 0x20c   :  { %2220 = vmatmul.mubr.f32.vlgmr.msra.gmra.mrb[4].mxu0 %v3168_v29  ;;  %2702 = vmatprep.subr.bf16.mxu0 %v3581_v8  ;;  %v3604_v31 = vpack.c.bf16 %v3832_v32, %v3830_v59  ;;  %v2659_v25 = vpack.c.bf16 %v3836_v12, %v3834_v30  ;;  %v3837_v29 = vand.u32 4294901760, %v3207_v46  ;;  %v3847_v46 = vand.u32 4294901760, %v3846_v6 }
 0x20d   :  { %2632 = vmatpush1.bf16.msra.mxu1 %v2631_v58  ;;  %2704 = vmatpush1.bf16.msra.mxu0 %v3587_v11  ;;  %v3845_v58 = vand.u32 4294901760, %v3844_v35  ;;  %v3852_v59 = vand.u32 4294901760, %v3851_v5  ;;  %v3854_v32 = vand.u32 4294901760, %v3853_v44 }
 0x20e   :  { %2634 = vmatprep.subr.bf16.mxu1 %v2633_v37  ;;  %2706 = vmatprep.subr.bf16.mxu0 %v3604_v31  ;;  %v2635_v41 = vpack.c.bf16 %v3838_v18, %v3837_v29  ;;  %v3850_v37 = vand.u32 4294901760, %v3849_v50 }
 0x20f   :  { %2308 = vmatprep.mubr.f32.mxu0 %v3783_v1  ;;  %v2663_v34 = vpack.c.bf16 %v3847_v46, %v3845_v58  ;;  %v2667_v30 = vpack.c.bf16 %v3855_v2, %v3854_v32 }
 0x210   :  { %v2665_v51 = vpack.c.bf16 %v3852_v59, %v3850_v37 }
 0x211   :  { %2636 = vmatpush1.bf16.msra.mxu1 %v2635_v41  ;;  %2708 = vmatpush1.bf16.msra.mxu0 %v2659_v25 }
 0x212   :  { %1149 = vmatprep.subr.mxu1 %v3843_v48  ;;  %2710 = vmatprep.subr.bf16.mxu0 %v2661_v36 }
 0x215   :  { %1153 = vmatpush1.msra.mxu1 %v3848_v16  ;;  %2712 = vmatpush1.bf16.msra.mxu0 %v2663_v34 }
 0x216   :  { %1202 = vmatmul.mubr.f32.vlgmr.msra.gmra.mrb[2].mxu1 %v3157_v15  ;;  %2638 = vmatprep.subr.bf16.mxu1 %v3118_v42  ;;  %v3856_v42 = vand.u32 4294901760, %v3065_v10  ;;  %v3861_v10 = vand.u32 4294901760, %v3384_v3  ;;  %v3866_v3 = vand.u32 4294901760, %v3450_v45 }
 0x217   :  { %2640 = vmatpush1.bf16.msra.mxu1 %v3114_v39  ;;  %2714 = vmatprep.subr.bf16.mxu0 %v2665_v51  ;;  %v3858_v39 = vand.u32 4294901760, %v3060_v9 }
 0x218   :  { %2642 = vmatprep.subr.bf16.mxu1 %v3138_v55  ;;  %1290 = vmatprep.mubr.f32.mxu1 %v3783_v1  ;;  %v2717_v0 = vpack.c.bf16 %v3857_v23, %v3856_v42  ;;  %v3859_v55 = vand.u32 4294901760, %v3296_v28  ;;  %v2729_v28 = vpack.c.bf16 %v2041_v24, %v3866_v3 }
 0x219   :  { %2716 = vmatpush1.bf16.msra.mxu0 %v2667_v30 }
 0x21a   :  { %2259 = vmatprep.subr.mxu0 %v3495_v49  ;;  %v2719_v20 = vpack.c.bf16 %v3859_v55, %v3858_v39 }
 0x21b   :  { %2644 = vmatpush1.bf16.msra.mxu1 %v3140_v56  ;;  %v3860_v56 = vld [vmem:[#allocation28_spill] sm:$0xff] }
 0x21c   :  { %2646 = vmatprep.subr.bf16.mxu1 %v3162_v22  ;;  %v3862_v22 = vand.u32 4294901760, %v3415_v19 }
 0x21d   :  { %2261 = vmatpush1.msra.mxu0 %v3497_v13 }
 0x21e   :  { %2312 = vmatmul.mubr.f32.vlgmr.msra.gmra.mrb[4].mxu0 %v3183_v7  ;;  %2718 = vmatprep.subr.bf16.mxu0 %v2717_v0  ;;  %v2725_v9 = vpack.c.bf16 %v3862_v22, %v3861_v10  ;;  %v3865_v7 = vand.u32 4294901760, %v3420_v17 }
 0x21f   :  { %2648 = vmatpush1.bf16.msra.mxu1 %v3180_v61  ;;  %2720 = vmatpush1.bf16.msra.mxu0 %v2719_v20  ;;  %v3864_v61 = vand.u32 4294901760, %v3390_v53  ;;  %v3867_v53 = vand.u32 4294901760, %v3458_v33 }
 0x220   :  { %2650 = vmatprep.subr.bf16.mxu1 %v3190_v40  ;;  %2722 = vmatprep.subr.bf16.mxu0 %v3860_v56 }
 0x221   :  { %2436 = vmatprep.mubr.f32.mxu0 %v3783_v1  ;;  %v2727_v40 = vpack.c.bf16 %v3865_v7, %v3864_v61 }
 0x223   :  { %2652 = vmatpush1.bf16.msra.mxu1 %v3218_v26  ;;  %2724 = vmatpush1.bf16.msra.mxu0 %v3863_v43 }
 0x224   :  { %1241 = vmatprep.subr.mxu1 %v3209_v14  ;;  %2726 = vmatprep.subr.bf16.mxu0 %v2725_v9  ;;  %v3868_v14 = vand.u32 4294901760, %v3484_v38 }
 0x226   :  { %v2731_v26 = vpack.c.bf16 %v3868_v14, %v3867_v53 }
 0x227   :  { %1243 = vmatpush1.msra.mxu1 %v3242_v54  ;;  %2728 = vmatpush1.bf16.msra.mxu0 %v2727_v40  ;;  %v3869_v54 = vld [vmem:[#allocation17_spill] sm:$0xff] }
 0x228   :  { %1292 = vmatmul.mubr.f32.vlgmr.msra.gmra.mrb[2].mxu1 %v3157_v15  ;;  %2654 = vmatprep.subr.bf16.mxu1 %v3581_v8 }
 0x229   :  { %2656 = vmatpush1.bf16.msra.mxu1 %v3587_v11  ;;  %2730 = vmatprep.subr.bf16.mxu0 %v2729_v28 }
 0x22a   :  { %2658 = vmatprep.subr.bf16.mxu1 %v3604_v31  ;;  %1943 = vmatprep.mubr.f32.mxu1 %v3783_v1 }
 0x22b   :  { %2732 = vmatpush1.bf16.msra.mxu0 %v2731_v26 }
 0x22c   :  { %2385 = vmatprep.subr.mxu0 %v2053_v60 }
 0x22d   :  { %2660 = vmatpush1.bf16.msra.mxu1 %v2659_v25 }
 0x22e   :  { %2662 = vmatprep.subr.bf16.mxu1 %v2661_v36 }
 0x22f   :  { %2389 = vmatpush1.msra.mxu0 %v2059_v63 }
 0x230   :  { %2438 = vmatmul.mubr.f32.vlgmr.msra.gmra.mrb[4].mxu0 %v3157_v15  ;;  %2734 = vmatprep.subr.bf16.mxu0 %v3581_v8 }
 0x231   :  { %2664 = vmatpush1.bf16.msra.mxu1 %v2663_v34  ;;  %2736 = vmatpush1.bf16.msra.mxu0 %v3587_v11 }
 0x232   :  { %2666 = vmatprep.subr.bf16.mxu1 %v2665_v51  ;;  %2738 = vmatprep.subr.bf16.mxu0 %v3604_v31 }
 0x233   :  { %2526 = vmatprep.mubr.f32.mxu0 %v3783_v1 }
 0x235   :  { %2668 = vmatpush1.bf16.msra.mxu1 %v2667_v30  ;;  %2740 = vmatpush1.bf16.msra.mxu0 %v2659_v25 }
 0x236   :  { %1894 = vmatprep.subr.mxu1 %v3495_v49  ;;  %2742 = vmatprep.subr.bf16.mxu0 %v2661_v36 }
 0x239   :  { %1896 = vmatpush1.msra.mxu1 %v3497_v13  ;;  %2744 = vmatpush1.bf16.msra.mxu0 %v2663_v34 }
 0x23a   :  { %1949 = vmatmul.mubr.f32.vlgmr.msra.gmra.mrb[4].mxu1 %v3869_v54  ;;  %2746 = vmatprep.subr.bf16.mxu0 %v2665_v51 }
 0x23d   :  { %2748 = vmatpush1.bf16.msra.mxu0 %v2667_v30 }
 0x23e   :  { %2477 = vmatprep.subr.mxu0 %v3495_v49 }
 0x241   :  { %2479 = vmatpush1.msra.mxu0 %v3497_v13 }
 0x242   :  { %2528 = vmatmul.mubr.f32.vlgmr.msra.gmra.mrb[4].mxu0 %v3157_v15 }
 0x244   :  { %v618_v63 = vpop.permute.xlu0 %617 }
 0x2fb   :  { %v1293_v1 = vpop.f32.mrb[2].mxu1 }
 0x2fc   :  { %v2753_v24 = vadd.f32 %v1293_v1, %v618_v63  ;;  %v1295_v45 = vpop.f32.mrb[3].mxu1 }
 0x2fd   :  { %v2754_v19 = vadd.f32 %v1295_v45, %v618_v63 }
 0x2fe   :  { %v1298_v17 = vmax.f32 %v2753_v24, 0.0 }
 0x2ff   :  { %v1299_v60 = vmax.f32 %v2754_v19, 0.0 }
 0x300   :  { %1300 = vst [vmem:[#allocation8] sm:$0xff] %v1298_v17 }
 0x301   :  { %1301 = vst [vmem:[#allocation8 + $0x8] sm:$0xff] %v1299_v60 }
 0x30d   :  { %v1950_v33 = vpop.f32.mrb[4].mxu1 }
 0x30e   :  { %v1952_v4 = vpop.f32.mrb[5].mxu1  ;;  %v1951_v38 = vadd.f32 %v1950_v33, %v618_v63 }
 0x30f   :  { %v1953_v52 = vadd.f32 %v1952_v4, %v618_v63 }
 0x315   :  { %v2529_v27 = vpop.f32.mrb[4].mxu0 }
 0x316   :  { %v2758_v8 = vadd.f32 %v2529_v27, %v1951_v38  ;;  %v2531_v49 = vpop.f32.mrb[5].mxu0 }
 0x317   :  { %v2760_v13 = vadd.f32 %v2531_v49, %v1953_v52 }
 0x318   :  { %v2534_v15 = vmax.f32 %v2758_v8, 0.0 }
 0x319   :  { %v2535_v11 = vmax.f32 %v2760_v13, 0.0 }
 0x31a   :  { %2537 = vst [vmem:[#allocation8 + $0x10] sm:$0xff] %v2534_v15 }
 0x31b   :  { %2538 = vst [vmem:[#allocation8 + $0x18] sm:$0xff] %v2535_v11 }
 0x31c   :  { %2875 = shalt.err (!%p2872_p6)
}
 0x31d   :  { %s2876_s19 = scalar_lea.hbm %s3713_s2, 512 }
 0x31e   :  { %p2877_p7 = scmp.ne.s32.totalorder %s3713_s2, %s2876_s19  ;;  %p2880_p8 = scmp.lt.u32.totalorder %s2876_s19, %s3713_s2 }
 0x320   :  { %p2882_p9 = pnand %p2880_p8, %p2877_p7 }
 0x322   :  { %2885 = shalt.err (!%p2882_p9)
}
 0x323   :  { %s2909_s24 = smov 256   ;;  %s2910_s25 = smov 16  }
 0x324   :  { %2550 = dma.vmem_to_hbm [thread:$0]  %s2545_s15, 512, %s3713_s2, [#allocation5], %s2909_s24, %s2909_s24, %s2910_s25  }
 0x325   :  { %2890 = dma.done.wait [#allocation5], 512  }
 0x326   :  { %2891 = vsyncadd [#allocation5], 4294966784 }
 0x327   :  { %2554 = vsyncpa [#allocation4], 1 }
 0x328   :  { %2555 = vsyncpa [#allocation7], 1 }
 0x329   :  { %2556 = vsyncpa [#allocation5], 1 }

</bundles_post_ra>
